<compile_context>
chip_gen: v6e
topology: v6e:2x2x1
jax: 0.10.0
libtpu: 0.0.40
codegen_flags: <defaults>
</compile_context>

<pallas_src>
import functools

import jax
import jax.numpy as jnp
from jax import lax
from jax.experimental import pallas as pl
from jax.experimental.pallas import tpu as pltpu


def _cdiv(a, b):
    return -(-a // b)


def _iou_partial_kernel(logits_ref, labels_ref, out_ref, *, ignore_lb, hw, tile_pix):
    """One (batch, pixel-tile) step: write (inter, labeled_count) partials.

    logits_ref: (1, C, T)   labels_ref: (1, 1, T) int32   out_ref: (1, 1, 1, 128)
    """
    x = logits_ref[0].astype(jnp.float32)             # (C, T) f32 compute
    lab = labels_ref[0]                               # (1, T) int32
    n_classes = x.shape[0]

    # Numerically-stable softmax denominator over the class (sublane) axis.
    # exp(x - m) is single-use so it can fuse into the reduce (no (C,T) temp
    # kept live).
    m = jnp.max(x, axis=0, keepdims=True)             # (1, T)
    denom = jnp.sum(jnp.exp(x - m), axis=0, keepdims=True)   # (1, T)

    # Logit at the label class (0 where no class matches / garbage lanes).
    cls = lax.broadcasted_iota(jnp.int32, x.shape, 0)               # (C, T)
    x_lab = jnp.sum(jnp.where(lab == cls, x, 0.0), axis=0, keepdims=True)  # (1, T)

    # Per-pixel validity: real class label (ignore_lb / out-of-range -> the
    # one_hot(C+1)[:, :C] row is all zeros) AND inside the image (the last
    # pixel tile may be a ragged / padded tail with stale buffer contents).
    pix = (pl.program_id(1) * tile_pix
           + lax.broadcasted_iota(jnp.int32, (1, tile_pix), 1))     # (1, T)
    valid = ((lab != ignore_lb) & (lab >= 0) & (lab < n_classes)
             & (pix < hw))                                          # (1, T)

    # p_label = softmax prob at the label class (0 for ignored / padded pixels).
    # Reciprocal-multiply keeps the divide off the VALU; exact (approx=False)
    # to stay within the tight test tolerance.
    p_lab = jnp.where(
        valid, jnp.exp(x_lab - m) * pl.reciprocal(denom, approx=False), 0.0)

    inter_t = jnp.sum(p_lab)                           # scalar partial
    labeled_t = jnp.sum(valid.astype(jnp.float32))     # scalar partial

    # Lane-dense 512 B writeback: [0]=inter partial, [1]=labeled count partial.
    c = lax.broadcasted_iota(jnp.int32, (1, 1, 1, 128), 3)
    out_ref[...] = jnp.where(c == 0, inter_t, jnp.where(c == 1, labeled_t, 0.0))


def _vmem_budget():
    """(max logits-block bytes, vmem_limit_bytes) per TPU generation."""
    try:
        info = pltpu.get_tpu_info()
        vmem_cap = getattr(info, "vmem_capacity_bytes", None)
    except Exception:  # pragma: no cover - hardware query best-effort only
        vmem_cap = None
    if vmem_cap is not None and vmem_cap > 64 * 1024 * 1024:
        # v5e / v6e: 128 MiB physical VMEM -> bigger tiles amortize the
        # ~0.35 us per-step overhead down to <5% of step time.
        return 6 * 1024 * 1024, 64 * 1024 * 1024
    # v7x (64 MiB VMEM) or unknown: medium tiles, modest limit.  In-kernel
    # intermediates add ~2-3x block bytes on top of the 2x double-buffered
    # input, so 4 MiB blocks stay comfortably inside the budget.
    return 4 * 1024 * 1024, 48 * 1024 * 1024


def _pick_tile_pix(hw, n_classes, itemsize, max_block_bytes):
    """Pixel-tile size: largest multiple of 128 whose logits block fits the
    byte cap; ragged tails are masked in-kernel, so hw need not divide."""
    cap_pix = max(128, max_block_bytes // (itemsize * n_classes))
    if hw <= cap_pix:
        return hw                       # single full-width block (always legal)
    cap_tile = max(128, (cap_pix // 128) * 128)
    n_tiles = _cdiv(hw, cap_tile)
    # Balance the tiles so the tail tile isn't tiny.
    return 128 * _cdiv(_cdiv(hw, 128), n_tiles)


def iou_loss(logits, labels, *, n_classes, ignore_lb=255,
             max_block_bytes=None, vmem_limit_bytes=None):
    """Pallas IoULoss. logits: (N, C, H, W), labels: (N, H, W) int."""
    N, C, H, W = logits.shape
    assert C == n_classes
    HW = H * W

    auto_block, auto_limit = _vmem_budget()
    if max_block_bytes is None:
        max_block_bytes = auto_block
    if vmem_limit_bytes is None:
        vmem_limit_bytes = auto_limit

    # Free reshapes only — no transpose, no pad, no dtype upcast of logits.
    lf = logits.reshape(N, C, HW)
    lab = jnp.asarray(labels, jnp.int32).reshape(N, 1, HW)

    tile_pix = _pick_tile_pix(HW, C, jnp.dtype(logits.dtype).itemsize,
                              max_block_bytes)
    n_pix_tiles = _cdiv(HW, tile_pix)

    kernel = functools.partial(_iou_partial_kernel, ignore_lb=ignore_lb,
                               hw=HW, tile_pix=tile_pix)

    partials = pl.pallas_call(
        kernel,
        out_shape=jax.ShapeDtypeStruct((N, n_pix_tiles, 1, 128), jnp.float32),
        grid_spec=pltpu.PrefetchScalarGridSpec(
            num_scalar_prefetch=0,
            grid=(N, n_pix_tiles),
            in_specs=[
                pl.BlockSpec((1, C, tile_pix), lambda n, t: (n, 0, t)),
                pl.BlockSpec((1, 1, tile_pix), lambda n, t: (n, 0, t)),
            ],
            out_specs=pl.BlockSpec((1, 1, 1, 128), lambda n, t: (n, t, 0, 0)),
        ),
        compiler_params=pltpu.CompilerParams(
            dimension_semantics=("parallel", "parallel"),
            vmem_limit_bytes=vmem_limit_bytes,
        ),
    )(lf, lab)

    # Finish the tiny reduction in plain JAX: union = N*HW + n_labeled - inter.
    inter_total = jnp.sum(partials[:, :, 0, 0])
    labeled_total = jnp.sum(partials[:, :, 0, 1])
    union_total = jnp.float32(N * HW) + labeled_total - inter_total
    return 1.0 - inter_total / (union_total + 1e-7)


def _iou_loss_ref(logits, labels, *, n_classes, ignore_lb=255):
    """Pure-JAX reference mirroring the PyTorch forward."""
    probs = jax.nn.softmax(logits.astype(jnp.float32), axis=1)
    lab = jnp.where(labels == ignore_lb, n_classes, labels)
    true = jax.nn.one_hot(lab, n_classes + 1, dtype=jnp.float32)  # (N,H,W,C+1)
    true = jnp.transpose(true, (0, 3, 1, 2))[:, :n_classes, :, :]
    inter = true * probs
    union = probs + true - inter
    return 1.0 - jnp.sum(inter) / (jnp.sum(union) + 1e-7)


if __name__ == "__main__":
    key = jax.random.PRNGKey(0)
    k1, k2, k3 = jax.random.split(key, 3)

    N, C, H, W = 2, 4, 16, 16
    logits = jax.random.normal(k1, (N, C, H, W), dtype=jnp.float32)
    labels = jax.random.randint(k2, (N, H, W), 0, C, dtype=jnp.int32)
    # sprinkle some ignore labels
    ignore_mask = jax.random.bernoulli(k3, 0.1, (N, H, W))
    labels = jnp.where(ignore_mask, jnp.int32(255), labels)

    loss = jax.block_until_ready(iou_loss(logits, labels, n_classes=C, ignore_lb=255))
    ref = _iou_loss_ref(logits, labels, n_classes=C, ignore_lb=255)
    assert jnp.allclose(loss, ref, atol=1e-5, rtol=1e-5), (loss, ref)

    # Ragged path: HW=200 with a tiny forced block cap exercises the cdiv grid
    # plus in-kernel tail masking (tile=128, last tile half-padded).
    H2, W2 = 10, 20
    logits2 = jax.random.normal(k1, (N, C, H2, W2), dtype=jnp.float32)
    labels2 = jax.random.randint(k2, (N, H2, W2), 0, C, dtype=jnp.int32)
    labels2 = jnp.where(jax.random.bernoulli(k3, 0.1, (N, H2, W2)),
                        jnp.int32(255), labels2)
    loss2 = jax.block_until_ready(
        iou_loss(logits2, labels2, n_classes=C, ignore_lb=255,
                 max_block_bytes=128 * C * 4))
    ref2 = _iou_loss_ref(logits2, labels2, n_classes=C, ignore_lb=255)
    assert jnp.allclose(loss2, ref2, atol=1e-5, rtol=1e-5), (loss2, ref2)

    print("KERNEL_OK")
</pallas_src>

<mosaic_0001>
module attributes {stable_mosaic.version = 11 : i64} {
  func.func @_iou_partial_kernel(%arg0: i32, %arg1: i32, %arg2: memref<1x4x256xf32, #tpu.memory_space<vmem>>, %arg3: memref<1x1x256xi32, #tpu.memory_space<vmem>>, %arg4: memref<1x1x1x128xf32, #tpu.memory_space<vmem>>) attributes {dimension_semantics = [#tpu.dimension_semantics<parallel>, #tpu.dimension_semantics<parallel>], iteration_bounds = array<i64: 2, 1>, scalar_prefetch = 0 : i64, scratch_operands = 0 : i64, tpu.core_type = #tpu.core_type<tc>, window_params = [{transform_indices = @transform_0, window_bounds = array<i64: 1, 4, 256>}, {transform_indices = @transform_1, window_bounds = array<i64: 1, 1, 256>}, {transform_indices = @transform_2, window_bounds = array<i64: 1, 1, 1, 128>}]} {
    %c0 = arith.constant 0 : index
    %c0_0 = arith.constant 0 : index
    %c0_1 = arith.constant 0 : index
    %0 = vector.load %arg2[%c0, %c0_0, %c0_1] : memref<1x4x256xf32, #tpu.memory_space<vmem>>, vector<1x4x256xf32>
    %1 = vector.shape_cast %0 : vector<1x4x256xf32> to vector<4x256xf32>
    %c0_2 = arith.constant 0 : index
    %c0_3 = arith.constant 0 : index
    %c0_4 = arith.constant 0 : index
    %2 = vector.load %arg3[%c0_2, %c0_3, %c0_4] : memref<1x1x256xi32, #tpu.memory_space<vmem>>, vector<1x1x256xi32>
    %3 = vector.shape_cast %2 : vector<1x1x256xi32> to vector<1x256xi32>
    %cst = arith.constant dense<0xFF800000> : vector<256xf32>
    %4 = vector.multi_reduction <maximumf>, %1, %cst [0] : vector<4x256xf32> to vector<256xf32>
    %5 = vector.shape_cast %4 : vector<256xf32> to vector<1x256xf32>
    %6 = vector.broadcast %5 : vector<1x256xf32> to vector<4x256xf32>
    %7 = arith.subf %1, %6 : vector<4x256xf32>
    %8 = math.exp %7 : vector<4x256xf32>
    %cst_5 = arith.constant dense<0.000000e+00> : vector<256xf32>
    %9 = vector.multi_reduction <add>, %8, %cst_5 [0] : vector<4x256xf32> to vector<256xf32>
    %10 = vector.shape_cast %9 : vector<256xf32> to vector<1x256xf32>
    %11 = tpu.iota {dimensions = array<i32: 0>} : vector<4x256xi32>
    %12 = vector.broadcast %3 : vector<1x256xi32> to vector<4x256xi32>
    %13 = arith.cmpi eq, %12, %11 : vector<4x256xi32>
    %cst_6 = arith.constant 0.000000e+00 : f32
    %14 = vector.broadcast %cst_6 : f32 to vector<4x256xf32>
    %15 = arith.select %13, %1, %14 : vector<4x256xi1>, vector<4x256xf32>
    %cst_7 = arith.constant dense<0.000000e+00> : vector<256xf32>
    %16 = vector.multi_reduction <add>, %15, %cst_7 [0] : vector<4x256xf32> to vector<256xf32>
    %17 = vector.shape_cast %16 : vector<256xf32> to vector<1x256xf32>
    %c256_i32 = arith.constant 256 : i32
    %18 = arith.muli %arg1, %c256_i32 : i32
    %19 = tpu.iota {dimensions = array<i32: 1>} : vector<1x256xi32>
    %20 = vector.broadcast %18 : i32 to vector<1x256xi32>
    %21 = arith.addi %20, %19 : vector<1x256xi32>
    %c255_i32 = arith.constant 255 : i32
    %22 = vector.broadcast %c255_i32 : i32 to vector<1x256xi32>
    %23 = arith.cmpi ne, %3, %22 : vector<1x256xi32>
    %c0_i32 = arith.constant 0 : i32
    %24 = vector.broadcast %c0_i32 : i32 to vector<1x256xi32>
    %25 = arith.cmpi sge, %3, %24 : vector<1x256xi32>
    %26 = arith.andi %23, %25 : vector<1x256xi1>
    %c4_i32 = arith.constant 4 : i32
    %27 = vector.broadcast %c4_i32 : i32 to vector<1x256xi32>
    %28 = arith.cmpi slt, %3, %27 : vector<1x256xi32>
    %29 = arith.andi %26, %28 : vector<1x256xi1>
    %c256_i32_8 = arith.constant 256 : i32
    %30 = vector.broadcast %c256_i32_8 : i32 to vector<1x256xi32>
    %31 = arith.cmpi slt, %21, %30 : vector<1x256xi32>
    %32 = arith.andi %29, %31 : vector<1x256xi1>
    %33 = arith.subf %17, %5 : vector<1x256xf32>
    %34 = math.exp %33 : vector<1x256xf32>
    %35 = tpu.reciprocal %10 : vector<1x256xf32> -> vector<1x256xf32>
    %36 = arith.mulf %34, %35 : vector<1x256xf32>
    %cst_9 = arith.constant 0.000000e+00 : f32
    %37 = vector.broadcast %cst_9 : f32 to vector<1x256xf32>
    %38 = arith.select %32, %36, %37 : vector<1x256xi1>, vector<1x256xf32>
    %39 = vector.shape_cast %38 : vector<1x256xf32> to vector<1x1x256xf32>
    %cst_10 = arith.constant dense<0.000000e+00> : vector<1xf32>
    %40 = vector.multi_reduction <add>, %39, %cst_10 [1, 2] : vector<1x1x256xf32> to vector<1xf32>
    %41 = vector.shape_cast %40 : vector<1xf32> to vector<1x1x1xf32>
    %42 = vector.extract %41[0, 0, 0] : f32 from vector<1x1x1xf32>
    %43 = arith.extui %32 : vector<1x256xi1> to vector<1x256xi32>
    %44 = arith.sitofp %43 : vector<1x256xi32> to vector<1x256xf32>
    %45 = vector.shape_cast %44 : vector<1x256xf32> to vector<1x1x256xf32>
    %cst_11 = arith.constant dense<0.000000e+00> : vector<1xf32>
    %46 = vector.multi_reduction <add>, %45, %cst_11 [1, 2] : vector<1x1x256xf32> to vector<1xf32>
    %47 = vector.shape_cast %46 : vector<1xf32> to vector<1x1x1xf32>
    %48 = vector.extract %47[0, 0, 0] : f32 from vector<1x1x1xf32>
    %49 = tpu.iota {dimensions = array<i32: 3>} : vector<1x1x1x128xi32>
    %c0_i32_12 = arith.constant 0 : i32
    %50 = vector.broadcast %c0_i32_12 : i32 to vector<1x1x1x128xi32>
    %51 = arith.cmpi eq, %49, %50 : vector<1x1x1x128xi32>
    %c1_i32 = arith.constant 1 : i32
    %52 = vector.broadcast %c1_i32 : i32 to vector<1x1x1x128xi32>
    %53 = arith.cmpi eq, %49, %52 : vector<1x1x1x128xi32>
    %cst_13 = arith.constant 0.000000e+00 : f32
    %54 = vector.broadcast %48 : f32 to vector<1x1x1x128xf32>
    %55 = vector.broadcast %cst_13 : f32 to vector<1x1x1x128xf32>
    %56 = arith.select %53, %54, %55 : vector<1x1x1x128xi1>, vector<1x1x1x128xf32>
    %57 = vector.broadcast %42 : f32 to vector<1x1x1x128xf32>
    %58 = arith.select %51, %57, %56 : vector<1x1x1x128xi1>, vector<1x1x1x128xf32>
    %c0_14 = arith.constant 0 : index
    %c0_15 = arith.constant 0 : index
    %c0_16 = arith.constant 0 : index
    %c0_17 = arith.constant 0 : index
    %59 = vector.load %arg4[%c0_14, %c0_15, %c0_16, %c0_17] : memref<1x1x1x128xf32, #tpu.memory_space<vmem>>, vector<1x1x1x128xf32>
    tpu.vector_store %arg4[%c0_14, %c0_15, %c0_16, %c0_17], %58 {strides = array<i32>} : memref<1x1x1x128xf32, #tpu.memory_space<vmem>>, vector<1x1x1x128xf32>,
    return
  }
  func.func @transform_0(%arg0: i32, %arg1: i32) -> (i32, i32, i32) {
    %c0_i32 = arith.constant 0 : i32
    %c0_i32_0 = arith.constant 0 : i32
    return %arg0, %c0_i32, %arg1 : i32, i32, i32
  }
  func.func @transform_1(%arg0: i32, %arg1: i32) -> (i32, i32, i32) {
    %c0_i32 = arith.constant 0 : i32
    %c0_i32_0 = arith.constant 0 : i32
    return %arg0, %c0_i32, %arg1 : i32, i32, i32
  }
  func.func @transform_2(%arg0: i32, %arg1: i32) -> (i32, i32, i32, i32) {
    %c0_i32 = arith.constant 0 : i32
    %c0_i32_0 = arith.constant 0 : i32
    %c0_i32_1 = arith.constant 0 : i32
    return %arg0, %arg1, %c0_i32, %c0_i32_0 : i32, i32, i32, i32
  }
}

</mosaic_0001>

<bundles_post_ra>
// kernel: tpu_custom_call.1
= control target key start
LH: loop header
LB: loop body
LE: loop exit
PB: predicated region body
PF: predicated region fallthrough
CT: control target
= control target key end

     0   :  { %7 = vsyncpa [#allocation3], 0  ;;  %s999_s0 = inlined_call_operand.hbm [shape: f32[2,4,256], index: 0, kind: input, shape index: {}]   ;;  %s1000_s1 = inlined_call_operand.hbm [shape: s32[2,1,256], index: 1, kind: input, shape index: {}]   ;;  %s1001_s2 = inlined_call_operand.hbm [shape: f32[2,1,1,128], index: 2, kind: output, shape index: {}]  }
   0x1   :  { %9 = vsyncpa [#allocation3 + $0x1], 0 }
   0x2   :  { %10 = vsyncpa [#allocation6], 0 }
   0x3   :  { %12 = vsyncpa [#allocation6 + $0x1], 0 }
   0x4   :  { %13 = vsyncpa [#allocation4], 0 }
   0x5   :  { %15 = vsyncpa [#allocation4 + $0x1], 0  ;;  %s796_s9 = smov 0   ;;  %s798_s10 = smov 0  }
   0x6   :  { %s800_s11 = smov 0   ;;  %s802_s12 = smov 0  }
   0x7   :  { %s804_s13 = smov 0   ;;  %s806_s14 = smov 0  }
   0x8 LB: > { %s529_s15 = sadd.s32 4294967295, %s773_s14   ;;  %s530_s16 = sadd.s32 4294967294, %s773_s14   ;;  %s773_s14 = sphi %s806_s14, %s21_s14   ;;  %s769_s13 = sphi %s804_s13, %s1013_s13   ;;  %s765_s12 = sphi %s802_s12, %s1012_s12   ;;  %s761_s11 = sphi %s800_s11, %s1011_s11   ;;  %s757_s10 = sphi %s798_s10, %s1010_s10   ;;  %s753_s9 = sphi %s796_s9, %s1009_s9  }
   0x9   : > { %s33_s17 = sadd.s32 1, %s769_s13  ;;  %s42_s18 = sadd.s32 1, %s761_s11 }
   0xa   : > { %p35_p0 = scmp.ge.s32.totalorder %s33_s17, 2  ;;  %p49_p1 = scmp.ne.s32.totalorder %s761_s11, %s757_s10 }
   0xb   : > { %p50_p2 = scmp.eq.s32.totalorder %s773_s14, 0  ;;  %p55_p3 = scmp.ne.s32.totalorder %s757_s10, %s753_s9 }
   0xc   : > { %s1015_s17 = smov (%p35_p0, %s33_s17), 0  ;;  %p56_p5 = scmp.eq.s32.totalorder %s529_s15, 0 }
   0xd   : > { %p837_p4 = por %p50_p2, %p49_p1  ;;  %s37_s20 = ssub.s32 %s769_s13, %s1015_s17 }
   0xe   : > { %p109_p6 = scmp.eq.s32.totalorder %s529_s15, 1  ;;  %p40_p7 = scmp.eq.s32.totalorder %s37_s20, 0 }
   0xf   : > { %p843_p8 = por %p56_p5, %p55_p3  ;;  %p115_p10 = scmp.eq.s32.totalorder %s530_s16, 1 }
  0x10   : > { %p847_p9 = por %p109_p6, %p49_p1  ;;  %p569_p13 = scmp.lt.s32.totalorder %s773_s14, 2 }
  0x11   : > { %s852_s23 = scalar_select %p40_p7, %s761_s11, %s42_s18  }
  0x12   : > { %p854_p11 = por %p115_p10, %p55_p3  ;;  %s861_s25 = sand.u32 1, %s761_s11  }
  0x13   : > { %s533_s26 = sshll.u32 %s861_s25, 3  ;;  %s546_s27 = sshll.u32 %s769_s13, 7 }
  0x14   : > { %s147_s30 = scalar_lea.hbm %s999_s0, %s546_s27  ;;  %s139_s3 = scalar_lea.vmem [#allocation2], %s533_s26 }
  0x15   : > { %s149_s4 = sshll.u32 %s139_s3, 4  ;;  %p870_p0 = pnand %p569_p13, %p837_p4  ;;  %s150_s4 = int_to_ptr.vmem [resolvable:$true] %s149_s4 }
  0x16   : > { %p539_p1 = scmp.ge.s32.totalorder %s773_s14, 1  ;;  %p175_p2 = scmp.lt.s32.totalorder %s773_s14, 3 }
  0x17   : > { %s136_s6 = scalar_lea.sflag [#allocation3], %s861_s25  ;;  %p635_p3 = pneg %p870_p0 }
  0x18   : > { %s646_s7 = scalar_lea.vmem %s150_s4, 128  ;;  %s775_s8 = smov [#allocation2]  }
  0x19   : > { %p647_p5 = scmp.ne.s32.totalorder %s150_s4, %s646_s7  ;;  %s651_s15 = sshll.u32 %s775_s8, 4  ;;  %s652_s15 = int_to_ptr.vmem [resolvable:$false] %s651_s15 }
  0x1a   : > { %s653_s16 = scalar_lea.vmem %s652_s15, 256  ;;  %p654_p4 = scmp.lt.s32.totalorder %s150_s4, %s652_s15 }
  0x1b   : > { %p649_p6 = pnand %p647_p5, %p635_p3  ;;  %p655_p10 = scmp.lt.s32.totalorder %s653_s16, %s646_s7 }
  0x1d   : > { %p650_p7 = pneg %p649_p6  ;;  %p656_p13 = por %p655_p10, %p654_p4 }
  0x1f   : > { %p657_p12 = pnand %p656_p13, %p650_p7 }
  0x21   : > { %660 = shalt.err (!%p657_p12)
}
  0x22   : > { %561 = dma.hbm_to_vmem [thread:$0]  (!%p870_p0), %s147_s30, 128, %s150_s4, %s136_s6  }
  0x23   : > { %p888_p5 = pnand %p539_p1, %p175_p2  ;;  %s536_s19 = sshll.u32 %s861_s25, 1 }
  0x24   : > { %s547_s20 = sshll.u32 %s769_s13, 5  ;;  %s160_s29 = scalar_lea.vmem [#allocation5], %s536_s19 }
  0x25   : > { %s168_s28 = scalar_lea.hbm %s1000_s1, %s547_s20  ;;  %s170_s3 = sshll.u32 %s160_s29, 4  ;;  %s171_s3 = int_to_ptr.vmem [resolvable:$true] %s170_s3 }
  0x26   : > { %s157_s7 = scalar_lea.sflag [#allocation6], %s861_s25  ;;  %s674_s8 = scalar_lea.vmem %s171_s3, 32 }
  0x27   : > { %p675_p12 = scmp.ne.s32.totalorder %s171_s3, %s674_s8  ;;  %s776_s30 = smov [#allocation5]  }
  0x28   : > { %s679_s4 = sshll.u32 %s776_s30, 4  ;;  %s680_s4 = int_to_ptr.vmem [resolvable:$false] %s679_s4 }
  0x29   : > { %p677_p6 = pnand %p675_p12, %p635_p3  ;;  %s681_s6 = scalar_lea.vmem %s680_s4, 64 }
  0x2a   : > { %p682_p1 = scmp.lt.s32.totalorder %s171_s3, %s680_s4  ;;  %p683_p2 = scmp.lt.s32.totalorder %s681_s6, %s674_s8 }
  0x2b   : > { %p678_p7 = pneg %p677_p6 }
  0x2c   : > { %p684_p4 = por %p683_p2, %p682_p1 }
  0x2e   : > { %p685_p10 = pnand %p684_p4, %p678_p7 }
  0x30   : > { %688 = shalt.err (!%p685_p10)
}
  0x31   : > { %564 = dma.hbm_to_vmem [thread:$0]  (!%p870_p0), %s168_s28, 32, %s171_s3, %s157_s7  }
  0x32   : > { %179 = sbr.rel (%p888_p5) target bundleno = 358 (0x166), region = 28  ;;  %s906_s25 = sand.u32 (!%p888_p5), 1, %s757_s10  }
  0x33   : > { %s540_s15 = sshll.u32 (!%p888_p5), %s906_s25, 3  ;;  %s182_s16 = scalar_lea.sflag (!%p888_p5), [#allocation3], %s906_s25 }
  0x34   : > { %s185_s19 = scalar_lea.vmem (!%p888_p5), [#allocation2], %s540_s15 }
  0x37   : > { %740 = dma.done.wait (%p843_p8), %s182_s16, 128  }
  0x38   : > { %742 = vsyncadd (%p843_p8), %s182_s16, 4294967168  ;;  %s541_s5 = sshll.u32 %s906_s25, 1  ;;  %s191_s18 = scalar_lea.sflag [#allocation6], %s906_s25 }
  0x39   : > { %s194_s20 = scalar_lea.vmem [#allocation5], %s541_s5 }
  0x3a   : > { %744 = dma.done.wait (%p843_p8), %s191_s18, 32  }
  0x3b   : > { %746 = vsyncadd (%p843_p8), %s191_s18, 4294967264  ;;  %v265_v0 = vlaneseq  ;;  %vm226_vm0 = vcmask 1043456   ;;  %v221_v4 = vld [vmem:[%s185_s19] sm:$0xff]  ;;  %v929_v5 = vld [vmem:[%s194_s20] sm:$0x3]  ;;  %vm366_vm10 = vcmask 1040384  }
  0x3c   : > { %v224_v6 = vcombine.high %v221_v4, %v221_v4  ;;  %v227_v7 = vsel %vm226_vm0, %v221_v4, -inf  ;;  %v777_v59 = vmov 1966171168   ;;  %vm300_vm3 = vcmp.ne.s32.totalorder %v929_v5, 255  ;;  %s543_s21 = sshll.u32 %s765_s12, 4  ;;  %s218_s27 = scalar_lea.vmem [#allocation7], %s906_s25 }
  0x3d   : > { %v921_v1 = vshrl.u32 %v265_v0, 7  ;;  %v228_v8 = vrot.slane %v227_v7, 4  ;;  %v311_v60 = vunpack.c.l.s4 %v777_v59  ;;  %vm301_vm4 = vcmp.ge.s32.totalorder %v929_v5, 0  ;;  %s425_s28 = sshll.u32 %s218_s27, 4  ;;  %s957_s8 = scalar_lea.hbm %s1001_s2, %s543_s21  ;;  %s426_s28 = int_to_ptr.vmem [resolvable:$true] %s425_s28 }
  0x3e   : > { %v234_v10 = vsel %vm226_vm0, %v224_v6, -inf  ;;  %vm302_vm5 = vmand %vm300_vm3, %vm301_vm4  ;;  %vm303_vm6 = vcmp.lt.s32.totalorder %v929_v5, 4  ;;  %s412_s30 = scalar_lea.sflag [#allocation4], %s906_s25  ;;  %s689_s12 = scalar_lea.vmem %s426_s28, 16 }
  0x3f   : > { %v924_v2 = vsub.s32 0, %v921_v1  ;;  %v927_v3 = vsub.s32 1, %v921_v1  ;;  %v229_v12 = vmax.f32 %v227_v7, %v228_v8  ;;  %v235_v13 = vrot.slane %v234_v10, 4  ;;  %vm304_vm7 = vmand %vm302_vm5, %vm303_vm6  ;;  %p690_p8 = scmp.ne.s32.totalorder %s426_s28, %s689_s12  ;;  %s780_s4 = smov [#allocation7]  }
  0x40   : > { %s693_s6 = sshll.u32 %s780_s4, 4  ;;  %s694_s6 = int_to_ptr.vmem [resolvable:$false] %s693_s6 }
  0x41   : > { %v270_v9 = vrot.slane %v929_v5, %v924_v2  ;;  %v274_v11 = vrot.slane %v929_v5, %v927_v3  ;;  %v230_v14 = vrot.slane %v229_v12, 2  ;;  %v236_v15 = vmax.f32 %v234_v10, %v235_v13  ;;  %p691_p0 = pnand %p690_p8, %p847_p9  ;;  %s695_s15 = scalar_lea.vmem %s694_s6, 32 }
  0x42   : > { %p696_p13 = scmp.lt.s32.totalorder %s426_s28, %s694_s6  ;;  %p697_p5 = scmp.lt.s32.totalorder %s695_s15, %s689_s12 }
  0x43   : > { %vm275_vm1 = vcmp.eq.s32.totalorder %v270_v9, %v921_v1  ;;  %vm276_vm2 = vcmp.eq.s32.totalorder %v274_v11, %v921_v1  ;;  %v231_v16 = vmax.f32 %v229_v12, %v230_v14  ;;  %v237_v17 = vrot.slane %v236_v15, 2  ;;  %p692_p3 = pneg %p691_p0 }
  0x44   : > { %v277_v18 = vsel %vm275_vm1, %v221_v4, 0.0  ;;  %v278_v21 = vsel %vm276_vm2, %v224_v6, 0.0  ;;  %v778_v6 = vmov 1   ;;  %p698_p12 = por %p697_p5, %p696_p13 }
  0x45   : > { %v232_v19 = vrot.slane %v231_v16, 1  ;;  %v238_v20 = vmax.f32 %v236_v15, %v237_v17  ;;  %v279_v24 = vsel %vm226_vm0, %v277_v18, 0.0  ;;  %v286_v25 = vsel %vm226_vm0, %v278_v21, 0.0 }
  0x46   : > { %v280_v27 = vrot.slane %v279_v24, 4  ;;  %v287_v29 = vrot.slane %v286_v25, 4  ;;  %v309_v7 = vcombine.low %v778_v6, %v778_v6  ;;  %v779_v18 = vmov 0.0   ;;  %p699_p6 = pnand %p698_p12, %p692_p3 }
  0x47   : > { %v233_v22 = vmax.f32 %v231_v16, %v232_v19  ;;  %v239_v23 = vrot.slane %v238_v20, 1 }
  0x48   : > { %v281_v31 = vadd.f32 %v280_v27, %v279_v24  ;;  %v288_v33 = vadd.f32 %v287_v29, %v286_v25 }
  0x49   : > { %v240_v26 = vmax.f32 %v238_v20, %v239_v23 }
  0x4a   : > { %v282_v34 = vrot.slane %v281_v31, 2  ;;  %v289_v35 = vrot.slane %v288_v33, 2 }
  0x4b   : > { %v243_v28 = vcombine.low %v233_v22, %v240_v26 }
  0x4c   : > { %v283_v36 = vadd.f32 %v282_v34, %v281_v31  ;;  %v290_v37 = vadd.f32 %v289_v35, %v288_v33 }
  0x4d   : > { %v245_v30 = vsub.f32 %v221_v4, %v243_v28  ;;  %v312_v4 = vunpack.c.0.s8 %v311_v60 }
  0x4e   : > { %v284_v38 = vrot.slane %v283_v36, 1  ;;  %v291_v39 = vrot.slane %v290_v37, 1 }
  0x4f   : > { %v246_v32 = vmul.f32 1.442695, %v245_v30  ;;  %v315_v8 = vsub.s32 %v312_v4, %v921_v1 }
  0x50   : > { %v285_v41 = vadd.f32 %v284_v38, %v283_v36  ;;  %v292_v44 = vadd.f32 %v291_v39, %v290_v37 }
  0x51   : > { %623 = vpow2.f32 %v246_v32  ;;  %v316_v9 = vrot.slane %v309_v7, %v315_v8 }
  0x52   : > { %v326_v49 = vsub.f32 %v285_v41, %v233_v22  ;;  %v327_v50 = vsub.f32 %v292_v44, %v240_v26 }
  0x53   : > { %v323_v12 = vrot.slane %v316_v9, %v315_v8 }
  0x54   : > { %v328_v55 = vmul.f32 1.442695, %v326_v49  ;;  %v330_v56 = vmul.f32 1.442695, %v327_v50 }
  0x55   : > { %vm324_vm8 = vcmp.ne.s32.totalorder %v323_v12, 0 }
  0x56   : > { %625 = vpow2.f32 %v328_v55  ;;  %vm325_vm9 = vmand %vm304_vm7, %vm324_vm8 }
  0x57   : > { %627 = vpow2.f32 %v330_v56  ;;  %v542_v19 = vsel %vm325_vm9, 1.0, %v779_v18 }
  0x58   : > { %v385_v21 = vrot.slane %v542_v19, %v924_v2  ;;  %v389_v22 = vrot.slane %v542_v19, %v927_v3 }
  0x5a   : > { %v392_v27 = vsel %vm366_vm10, %v385_v21, 0.0  ;;  %v393_v28 = vsel %vm366_vm10, %v389_v22, 0.0 }
  0x5b   : > { %v394_v30 = vadd.f32 %v393_v28, %v392_v27 }
  0x5e   : > { %v624_v40 = vpop.eup %623 }
  0x5f   : > { %v249_v42 = vcombine.high %v624_v40, %v624_v40  ;;  %v251_v43 = vsel %vm226_vm0, %v624_v40, 0.0 }
  0x60   : > { %v252_v45 = vrot.slane %v251_v43, 4 }
  0x61   : > { %v258_v46 = vsel %vm226_vm0, %v249_v42, 0.0 }
  0x62   : > { %v253_v47 = vadd.f32 %v252_v45, %v251_v43  ;;  %v259_v48 = vrot.slane %v258_v46, 4  ;;  %v295_v43 = vand.u32 127, %v265_v0 }
  0x63   : > { %v626_v10 = vpop.eup %625 }
  0x64   : > { %v254_v51 = vrot.slane %v253_v47, 2  ;;  %v260_v52 = vadd.f32 %v259_v48, %v258_v46  ;;  %v628_v11 = vpop.eup %627  ;;  %vm405_vm11 = vcmp.eq.s32.totalorder %v295_v43, 1  ;;  %vm404_vm12 = vcmp.eq.s32.totalorder %v295_v43, 0 }
  0x66   : > { %v255_v53 = vadd.f32 %v254_v51, %v253_v47  ;;  %v261_v54 = vrot.slane %v260_v52, 2 }
  0x68   : > { %v256_v57 = vrot.slane %v255_v53, 1  ;;  %v262_v58 = vadd.f32 %v261_v54, %v260_v52 }
  0x6a   : > { %v257_v61 = vadd.f32 %v256_v57, %v255_v53  ;;  %v263_v62 = vrot.slane %v262_v58, 1 }
  0x6c   : > { %v264_v63 = vadd.f32 %v263_v62, %v262_v58  ;;  %629 = vrcp.f32 %v257_v61 }
  0x6e   : > { %631 = vrcp.f32 %v264_v63 }
  0x79   : > { %v630_v13 = vpop.eup %629 }
  0x7a   : > { %v334_v14 = vmul.f32 %v630_v13, %v626_v10 }
  0x7b   : > { %v632_v15 = vpop.eup %631 }
  0x7c   : > { %v335_v16 = vmul.f32 %v632_v15, %v628_v11 }
  0x7e   : > { %v338_v17 = vcombine.low %v334_v14, %v335_v16 }
  0x80   : > { %v345_v1 = vrot.slane %v338_v17, %v315_v8 }
  0x82   : > { %v352_v20 = vrot.slane %v345_v1, %v315_v8 }
  0x84   : > { %v354_v23 = vsel %vm325_vm9, %v352_v20, 0.0 }
  0x85   : > { %v359_v24 = vrot.slane %v354_v23, %v924_v2  ;;  %v363_v5 = vrot.slane %v354_v23, %v927_v3 }
  0x87   : > { %v367_v25 = vsel %vm366_vm10, %v359_v24, 0.0  ;;  %v368_v26 = vsel %vm366_vm10, %v363_v5, 0.0 }
  0x88   : > { %v369_v29 = vadd.f32 %v368_v26, %v367_v25 }
  0x8a   : > { %370 = vadd.xlane.f32.xlu0 %v369_v29 }
  0x8e   : > { %395 = vadd.xlane.f32.xlu0 %v394_v30 }
 0x113   : > { %v371_v31 = vpop.xlane.xlu0 %370 }
 0x114   : > { %v372_v32 = vrot.slane %v371_v31, 4 }
 0x116   : > { %v373_v33 = vadd.f32 %v372_v32, %v371_v31 }
 0x117   : > { %v396_v34 = vpop.xlane.xlu0 %395 }
 0x118   : > { %v374_v35 = vrot.slane %v373_v33, 2  ;;  %v397_v36 = vrot.slane %v396_v34, 4 }
 0x11a   : > { %v398_v37 = vadd.f32 %v397_v36, %v396_v34  ;;  %v375_v2 = vadd.f32 %v374_v35, %v373_v33 }
 0x11c   : > { %v399_v38 = vrot.slane %v398_v37, 2  ;;  %v376_v3 = vrot.slane %v375_v2, 1 }
 0x11e   : > { %v400_v39 = vadd.f32 %v399_v38, %v398_v37  ;;  %v377_v40 = vadd.f32 %v376_v3, %v375_v2 }
 0x120   : > { %548 = vpush %v377_v40  ;;  %v401_v41 = vrot.slane %v400_v39, 1 }
 0x122   : > { %v402_v42 = vadd.f32 %v401_v41, %v400_v39 }
 0x124   : > { %550 = vpush %v402_v42 }
 0x151   : > { %s549_s26 = spop %548 }
 0x152   : > { %v408_v45 = vstv %s549_s26 }
 0x155   : > { %s551_s29 = spop %550 }
 0x156   : > { %v406_v44 = vstv %s551_s29 }
 0x157   : > { %v407_v46 = vsel %vm405_vm11, %v406_v44, 0.0 }
 0x158   : > { %v409_v47 = vsel %vm404_vm12, %v408_v45, %v407_v46 }
 0x159   : > { %410 = vst [vmem:[%s218_s27] sm:$0x1] %v409_v47 }
 0x15a   : > { %702 = shalt.err (!%p699_p6)
}
 0x15b   : > { %s703_s16 = scalar_lea.hbm %s957_s8, 16  ;;  %s707_s5 = scalar_lea.hbm %s1001_s2, 32 }
 0x15c   : > { %p704_p7 = scmp.ne.s32.totalorder %s957_s8, %s703_s16  ;;  %p708_p4 = scmp.lt.s32.totalorder %s957_s8, %s1001_s2 }
 0x15d   : > { %p709_p10 = scmp.lt.s32.totalorder %s707_s5, %s703_s16 }
 0x15e   : > { %p705_p1 = pnand %p704_p7, %p847_p9 }
 0x15f   : > { %p710_p8 = por %p709_p10, %p708_p4 }
 0x160   : > { %p706_p2 = pneg %p705_p1 }
 0x162   : > { %p711_p0 = pnand %p710_p8, %p706_p2 }
 0x164   : > { %714 = shalt.err (!%p711_p0)
}
 0x165   : > { %556 = dma.vmem_to_hbm [thread:$0]  (%p847_p9), %s426_s28, 16, %s957_s8, %s412_s30  }
 0x166 PF: > { %s437_s21 = sand.u32 1, %s753_s9   ;;  %p1008_p3 = scmp.ge.s32.totalorder %s773_s14, 2 }
 0x167   : > { %s438_s26 = scalar_lea.sflag [#allocation4], %s437_s21 }
 0x168   : > { %p566_p13 = pnand %p1008_p3, %p854_p11 }
 0x16a   : > { %p567_p5 = pneg %p566_p13 }
 0x16c   : > { %748 = dma.done.wait (%p567_p5), %s438_s26, 16  }
 0x16d   : > { %750 = vsyncadd (%p567_p5), %s438_s26, 4294967280  ;;  %s21_s14 = sadd.s32 1, %s773_s14   ;;  %s1009_s9 = smov %s757_s10 }
 0x16e   : > { %p18_p12 = scmp.ge.s32.totalorder %s21_s14, 4   ;;  %s1010_s10 = smov %s761_s11 }
 0x16f   : > { %s1011_s11 = smov %s852_s23  ;;  %s1012_s12 = smov %s769_s13 }
 0x170   : > { %s1013_s13 = smov %s1015_s17  ;;  %20 = sbr.rel (!%p18_p12) target bundleno = 8 (0x8), region = 86 }
 0x175   :  { %442 = vsyncpa [#allocation3], 1 }
 0x176   :  { %444 = vsyncpa [#allocation3 + $0x1], 1 }
 0x177   :  { %445 = vsyncpa [#allocation6], 1 }
 0x178   :  { %447 = vsyncpa [#allocation6 + $0x1], 1 }
 0x179   :  { %448 = vsyncpa [#allocation4], 1 }
 0x17a   :  { %450 = vsyncpa [#allocation4 + $0x1], 1 }

</bundles_post_ra>
